<compile_context>
chip_gen: v7x
topology: tpu7x:2x2x1
jax: 0.10.0
libtpu: 0.0.40
codegen_flags: <defaults>
</compile_context>

<pallas_src>
import jax
import jax.numpy as jnp
from jax.experimental import pallas as pl
from jax.experimental.pallas import tpu as pltpu

_LANE = 128
_SUBLANE = 8
_TILE_VMEM_BUDGET = 20 * 1024 * 1024   # per-step footprint target, safe on v5e/v6e/v7x
_TINY_VMEM_BUDGET = 12 * 1024 * 1024   # guard for the un-gridded latency path
_MAX_TILE_B = 8192                     # cap so v7x (64 MiB physical VMEM) stays comfortable
_TINY_B = 1024                         # below this a single un-gridded call wins (latency)


def _round_up(v, m):
    return ((v + m - 1) // m) * m


def _padded_bytes(rows, cols, itemsize=4):
    """f32 VMEM footprint of a (rows, cols) array after (8, 128) tile padding."""
    return _round_up(max(rows, 1), _SUBLANE) * _round_up(max(cols, 1), _LANE) * itemsize


def _weights_vmem_bytes(inputD, hD, outputD):
    # Constant index_map -> re-DMA is skipped, but count 2 buffers to be safe.
    return 2 * (_padded_bytes(inputD, hD) + _padded_bytes(1, hD)
                + _padded_bytes(hD, outputD) + _padded_bytes(1, outputD))


def _per_row_vmem_bytes(inputD, hD, outputD):
    """Lane-padding-aware bytes per batch row resident in VMEM per grid step."""
    x_row = 2 * _round_up(inputD, _LANE)     # double-buffered input tile
    o_row = 2 * _round_up(outputD, _LANE)    # double-buffered output tile
    h_row = _round_up(hD, _LANE)             # hidden activations
    t_row = 2 * _round_up(outputD, _LANE)    # logits / exp temporaries
    return 4 * (x_row + o_row + h_row + t_row)


def _cost_estimate(B, inputD, hD, outputD):
    flops = 2 * B * (inputD * hD + hD * outputD) + 6 * B * (hD + outputD)
    transcendentals = B * outputD                      # exp per logit
    bytes_accessed = 4 * (B * inputD + inputD * hD + hD
                          + hD * outputD + outputD + B * outputD)
    return pl.CostEstimate(flops=flops,
                           transcendentals=transcendentals,
                           bytes_accessed=bytes_accessed)


def _mlp_softmax_kernel(x_ref, w1_ref, b1_ref, w2_ref, b2_ref, o_ref):
    # Hidden layer: x @ W1 + b1, ReLU  (MXU matmul, f32 accumulate)
    h = jnp.dot(x_ref[...], w1_ref[...], preferred_element_type=jnp.float32)
    h = jnp.maximum(h + b1_ref[...], 0.0)              # (tb, hD) + (1, hD)

    # Output layer: h @ W2 + b2
    logits = jnp.dot(h, w2_ref[...], preferred_element_type=jnp.float32)
    logits = logits + b2_ref[...]                      # (tb, outD) + (1, outD)

    # Numerically-stable softmax along the feature (lane) axis == torch dim=1.
    m = jnp.max(logits, axis=-1, keepdims=True)        # XLU reduce
    e = jnp.exp(logits - m)                            # EUP
    denom = jnp.sum(e, axis=-1, keepdims=True)         # XLU reduce
    # Exact divide (NOT approx reciprocal) so each row sums to 1 to f32 rounding.
    o_ref[...] = (e / denom).astype(o_ref.dtype)


def pred_model_1_forward(x, w1, b1, w2, b2, *, tile_b=None):
    """x: (B, inputD) f32; w1: (inputD, hD); b1: (hD,); w2: (hD, outputD); b2: (outputD,)."""
    B, inputD = x.shape
    hD = w1.shape[1]
    outputD = w2.shape[1]

    # Biases as (1, N) so they map cleanly onto (sublane, lane) tiles.
    b1_2d = b1.reshape(1, hD)
    b2_2d = b2.reshape(1, outputD)
    ce = _cost_estimate(B, inputD, hD, outputD)

    w_bytes = _weights_vmem_bytes(inputD, hD, outputD)
    per_row = _per_row_vmem_bytes(inputD, hD, outputD)

    # Largest batch tile whose padded footprint fits the cross-generation budget.
    max_tile = max(((_TILE_VMEM_BUDGET - w_bytes) // per_row) // _SUBLANE * _SUBLANE,
                   _SUBLANE)
    if tile_b is None:
        tile_b = max_tile
    tile_b = max((int(tile_b) // _SUBLANE) * _SUBLANE, _SUBLANE)
    tile_b = min(tile_b, max_tile, _MAX_TILE_B)

    # ---- Tiny / latency path: no grid, everything whole in VMEM (guarded). ----
    whole_bytes = (w_bytes // 2 + _padded_bytes(B, inputD) + _padded_bytes(B, hD)
                   + 3 * _padded_bytes(B, outputD))
    if B <= min(_TINY_B, tile_b) and whole_bytes <= _TINY_VMEM_BUDGET:
        vmem = pl.BlockSpec(memory_space=pltpu.MemorySpace.VMEM)
        return pl.pallas_call(
            _mlp_softmax_kernel,
            out_shape=jax.ShapeDtypeStruct((B, outputD), x.dtype),
            in_specs=[vmem, vmem, vmem, vmem, vmem],
            out_specs=vmem,
            cost_estimate=ce,
        )(x, w1, b1_2d, w2, b2_2d)

    # ---- Throughput path: tile the batch. No wrapper pad/slice; Pallas masks
    # the ragged tail block's out-of-range rows on writeback. ----
    grid = (pl.cdiv(B, tile_b),)
    footprint = w_bytes + tile_b * per_row
    vmem_limit = int(footprint + (4 << 20))            # headroom; << 64 MiB v7x physical

    return pl.pallas_call(
        _mlp_softmax_kernel,
        out_shape=jax.ShapeDtypeStruct((B, outputD), x.dtype),
        grid=grid,
        in_specs=[
            pl.BlockSpec((tile_b, inputD), lambda i: (i, 0)),
            # Constant index_map -> same block every step: Pallas skips the
            # re-DMA, so weights/biases are effectively VMEM-resident.
            pl.BlockSpec((inputD, hD), lambda i: (0, 0)),
            pl.BlockSpec((1, hD), lambda i: (0, 0)),
            pl.BlockSpec((hD, outputD), lambda i: (0, 0)),
            pl.BlockSpec((1, outputD), lambda i: (0, 0)),
        ],
        out_specs=pl.BlockSpec((tile_b, outputD), lambda i: (i, 0)),
        compiler_params=pltpu.CompilerParams(
            # Batch tiles are independent -> shard across v7x's 2 TensorCores.
            dimension_semantics=("parallel",),
            vmem_limit_bytes=vmem_limit,
        ),
        cost_estimate=ce,
    )(x, w1, b1_2d, w2, b2_2d)


def init_params(key, inputD, hD, outputD):
    """Deterministic init mimicking torch.nn.Linear (uniform +/- 1/sqrt(fan_in))."""
    k1, k2, k3, k4 = jax.random.split(key, 4)
    bound1 = 1.0 / (inputD ** 0.5)
    bound2 = 1.0 / (hD ** 0.5)
    w1 = jax.random.uniform(k1, (inputD, hD), jnp.float32, -bound1, bound1)
    b1 = jax.random.uniform(k2, (hD,), jnp.float32, -bound1, bound1)
    w2 = jax.random.uniform(k3, (hD, outputD), jnp.float32, -bound2, bound2)
    b2 = jax.random.uniform(k4, (outputD,), jnp.float32, -bound2, bound2)
    return w1, b1, w2, b2


if __name__ == "__main__":
    # Small shapes consistent with the module's forward: x is (batch, inputD).
    B, inputD, hD, outputD = 8, 32, 64, 16

    key = jax.random.PRNGKey(0)
    kx, kp, kx2 = jax.random.split(key, 3)
    x = jax.random.normal(kx, (B, inputD), dtype=jnp.float32)
    w1, b1, w2, b2 = init_params(kp, inputD, hD, outputD)

    def ref_forward(xv):
        h = jnp.maximum(xv @ w1 + b1, 0.0)
        return jax.nn.softmax(h @ w2 + b2, axis=1)

    # Path 1: tiny batch -> single un-gridded call (no pipeline scaffolding).
    out = jax.block_until_ready(pred_model_1_forward(x, w1, b1, w2, b2))
    assert out.shape == (B, outputD)
    assert jnp.allclose(out, ref_forward(x), atol=1e-3, rtol=1e-3)
    # Exact normalization: rows sum to 1 to float32 rounding.
    assert jnp.allclose(jnp.sum(out, axis=1), jnp.ones((B,)), atol=1e-4)

    # Path 2: batch-tiled grid with a ragged tail (3 steps of 256 rows for a
    # 600-row batch).  The small explicit tile_b only exercises the multi-step
    # path at test scale; production default auto-sizes to thousands of rows.
    B2 = 600
    x2 = jax.random.normal(kx2, (B2, inputD), dtype=jnp.float32)
    out2 = jax.block_until_ready(
        pred_model_1_forward(x2, w1, b1, w2, b2, tile_b=256))
    assert out2.shape == (B2, outputD)
    assert jnp.allclose(out2, ref_forward(x2), atol=1e-3, rtol=1e-3)
    assert jnp.allclose(jnp.sum(out2, axis=1), jnp.ones((B2,)), atol=1e-4)

    print("KERNEL_OK")
</pallas_src>

<mosaic_0001>
module attributes {stable_mosaic.version = 11 : i64} {
  func.func @_mlp_softmax_kernel(%arg0: memref<8x32xf32, #tpu.memory_space<vmem>>, %arg1: memref<32x64xf32, #tpu.memory_space<vmem>>, %arg2: memref<1x64xf32, #tpu.memory_space<vmem>>, %arg3: memref<64x16xf32, #tpu.memory_space<vmem>>, %arg4: memref<1x16xf32, #tpu.memory_space<vmem>>, %arg5: memref<8x16xf32, #tpu.memory_space<vmem>>) attributes {dimension_semantics = [], scalar_prefetch = 0 : i64, scratch_operands = 0 : i64, tpu.core_type = #tpu.core_type<tc>} {
    %c0 = arith.constant 0 : index
    %c0_0 = arith.constant 0 : index
    %0 = vector.load %arg0[%c0, %c0_0] : memref<8x32xf32, #tpu.memory_space<vmem>>, vector<8x32xf32>
    %c0_1 = arith.constant 0 : index
    %c0_2 = arith.constant 0 : index
    %1 = vector.load %arg1[%c0_1, %c0_2] : memref<32x64xf32, #tpu.memory_space<vmem>>, vector<32x64xf32>
    %cst = arith.constant dense<0.000000e+00> : vector<8x64xf32>
    %2 = tpu.matmul %0, %1, %cst {dimension_numbers = #tpu.dot_dimension_numbers<[1], [0], [0], [1], [0, 0, 1, 1], [], []>} : vector<8x32xf32>, vector<32x64xf32>, vector<8x64xf32> -> vector<8x64xf32>
    %c0_3 = arith.constant 0 : index
    %c0_4 = arith.constant 0 : index
    %3 = vector.load %arg2[%c0_3, %c0_4] : memref<1x64xf32, #tpu.memory_space<vmem>>, vector<1x64xf32>
    %4 = vector.broadcast %3 : vector<1x64xf32> to vector<8x64xf32>
    %5 = arith.addf %2, %4 : vector<8x64xf32>
    %cst_5 = arith.constant 0.000000e+00 : f32
    %6 = vector.broadcast %cst_5 : f32 to vector<8x64xf32>
    %7 = arith.maximumf %5, %6 : vector<8x64xf32>
    %c0_6 = arith.constant 0 : index
    %c0_7 = arith.constant 0 : index
    %8 = vector.load %arg3[%c0_6, %c0_7] : memref<64x16xf32, #tpu.memory_space<vmem>>, vector<64x16xf32>
    %cst_8 = arith.constant dense<0.000000e+00> : vector<8x16xf32>
    %9 = tpu.matmul %7, %8, %cst_8 {dimension_numbers = #tpu.dot_dimension_numbers<[1], [0], [0], [1], [0, 0, 1, 1], [], []>} : vector<8x64xf32>, vector<64x16xf32>, vector<8x16xf32> -> vector<8x16xf32>
    %c0_9 = arith.constant 0 : index
    %c0_10 = arith.constant 0 : index
    %10 = vector.load %arg4[%c0_9, %c0_10] : memref<1x16xf32, #tpu.memory_space<vmem>>, vector<1x16xf32>
    %11 = vector.broadcast %10 : vector<1x16xf32> to vector<8x16xf32>
    %12 = arith.addf %9, %11 : vector<8x16xf32>
    %cst_11 = arith.constant dense<0xFF800000> : vector<8xf32>
    %13 = vector.multi_reduction <maximumf>, %12, %cst_11 [1] : vector<8x16xf32> to vector<8xf32>
    %14 = vector.shape_cast %13 : vector<8xf32> to vector<8x1xf32>
    %15 = vector.broadcast %14 : vector<8x1xf32> to vector<8x16xf32>
    %16 = arith.subf %12, %15 : vector<8x16xf32>
    %17 = math.exp %16 : vector<8x16xf32>
    %cst_12 = arith.constant dense<0.000000e+00> : vector<8xf32>
    %18 = vector.multi_reduction <add>, %17, %cst_12 [1] : vector<8x16xf32> to vector<8xf32>
    %19 = vector.shape_cast %18 : vector<8xf32> to vector<8x1xf32>
    %20 = vector.broadcast %19 : vector<8x1xf32> to vector<8x16xf32>
    %21 = arith.divf %17, %20 : vector<8x16xf32>
    %c0_13 = arith.constant 0 : index
    %c0_14 = arith.constant 0 : index
    %22 = vector.load %arg5[%c0_13, %c0_14] : memref<8x16xf32, #tpu.memory_space<vmem>>, vector<8x16xf32>
    tpu.vector_store %arg5[%c0_13, %c0_14], %21 {strides = array<i32>} : memref<8x16xf32, #tpu.memory_space<vmem>>, vector<8x16xf32>,
    return
  }
}

</mosaic_0001>

<bundles_post_ra>
// kernel: tpu_custom_call.1
= control target key start
LH: loop header
LB: loop body
LE: loop exit
PB: predicated region body
PF: predicated region fallthrough
CT: control target
= control target key end

     0   :  { %v322_v3 = vmov 0.0|0.0   ;;  %vm323_vm0 = vmmov 0   ;;  %v324_v6 = vmov 0.0   ;;  %s416_s0 = inlined_call_operand.vmem [shape: f32[8,32], index: 0, kind: input, shape index: {}]   ;;  %s417_s1 = inlined_call_operand.vmem [shape: f32[32,64], index: 1, kind: input, shape index: {}]   ;;  %s418_s2 = inlined_call_operand.vmem [shape: f32[1,64], index: 2, kind: input, shape index: {}]   ;;  %s419_s3 = inlined_call_operand.vmem [shape: f32[64,16], index: 3, kind: input, shape index: {}]   ;;  %s420_s4 = inlined_call_operand.vmem [shape: f32[1,16], index: 4, kind: input, shape index: {}]   ;;  %s421_s5 = inlined_call_operand.hbm [shape: f32[8,16], index: 5, kind: output, shape index: {}]  }
   0x1   :  { %v22_v0 = vld [vmem:[%s417_s1] sm:$0xff]  ;;  %v23_v1 = vld [vmem:[%s417_s1 + $0x8] sm:$0xff]  ;;  %v24_v2 = vld [vmem:[%s417_s1 + $0x10] sm:$0xff]  ;;  %272 = vmatprep.subr.bf16.mxu0 %v322_v3  ;;  %250 = vmatprep.mubr.msk.f32.mxu0 %vm323_vm0, %v324_v6 }
   0x2   :  { %v273_v4 = vpack.c.bf16 %v23_v1, %v22_v0  ;;  %v25_v5 = vld [vmem:[%s417_s1 + $0x18] sm:$0xff]  ;;  %v108_v7 = vld [vmem:[%s419_s3] sm:$0xff]  ;;  %278 = vmatprep.subr.bf16.mxu1 %v322_v3  ;;  %v109_v8 = vld [vmem:[%s419_s3 + $0x8] sm:$0xff]  ;;  %269 = vmatprep.mubr.msk.f32.mxu1 %vm323_vm0, %v324_v6 }
   0x3   :  { %v110_v9 = vld [vmem:[%s419_s3 + $0x10] sm:$0xff]  ;;  %v111_v10 = vld [vmem:[%s419_s3 + $0x18] sm:$0xff]  ;;  %v276_v11 = vpack.c.bf16 %v25_v5, %v24_v2  ;;  %v279_v12 = vpack.c.bf16 %v109_v8, %v108_v7 }
   0x4   :  { %274 = vmatpush3.bf16.msra.mxu0 %v273_v4 }
   0x5   :  { %275 = vmatprep.subr.bf16.mxu0 %v322_v3 }
   0x6   :  { %10 = vsyncpa [#allocation3], 0  ;;  %280 = vmatpush3.bf16.msra.mxu1 %v279_v12  ;;  %v282_v13 = vpack.c.bf16 %v111_v10, %v110_v9  ;;  %v112_v14 = vld [vmem:[%s419_s3 + $0x20] sm:$0xff]  ;;  %v113_v15 = vld [vmem:[%s419_s3 + $0x28] sm:$0xff]  ;;  %vm33_vm1 = vcmask 261120   ;;  %vm123_vm2 = vcmask 523264  }
   0x7   :  { %281 = vmatprep.subr.bf16.mxu1 %v322_v3  ;;  %v21_v16 = vld [vmem:[%s416_s0] sm:$0xff]  ;;  %v285_v17 = vpack.c.bf16 %v113_v15, %v112_v14  ;;  %v114_v18 = vld [vmem:[%s419_s3 + $0x30] sm:$0xff]  ;;  %v115_v19 = vld [vmem:[%s419_s3 + $0x38] sm:$0xff]  ;;  %vm197_vm3 = vcmask 130048  }
   0x8   :  { %277 = vmatpush3.bf16.msra.mxu0 %v276_v11  ;;  %v288_v20 = vpack.c.bf16 %v115_v19, %v114_v18  ;;  %v224_v21 = vld [vmem:[%s418_s2] ss:$0 sm:$0xff]  ;;  %s325_s2 = smov [#allocation2]  }
   0x9   :  { %v226_v26 = vld [vmem:[%s420_s4] ss:$0 sm:$0xff]  ;;  %s216_s3 = sshll.u32 %s325_s2, 4  ;;  %s217_s3 = int_to_ptr.vmem [resolvable:$true] %s216_s3 }
   0xa   :  { %283 = vmatpush3.bf16.msra.mxu1 %v282_v13  ;;  %s298_s4 = scalar_lea.vmem %s217_s3, 128  ;;  %p303_p1 = scmp.lt.s32.totalorder %s217_s3, %s217_s3 }
   0xb   :  { %251 = vmatmul.mubr.msk.f32.vlgmr.msra.gmra.mrb[0].mxu0 %vm33_vm1, %v21_v16  ;;  %284 = vmatprep.subr.bf16.mxu1 %v322_v3  ;;  %p299_p0 = scmp.ne.s32.totalorder %s217_s3, %s298_s4  ;;  %p304_p2 = scmp.lt.s32.totalorder %s298_s4, %s298_s4 }
   0xd   :  { %p305_p3 = por %p304_p2, %p303_p1 }
   0xe   :  { %286 = vmatpush3.bf16.msra.mxu1 %v285_v17 }
   0xf   :  { %287 = vmatprep.subr.bf16.mxu1 %v322_v3  ;;  %p306_p4 = pnand %p305_p3, %p299_p0 }
  0x12   :  { %289 = vmatpush3.bf16.msra.mxu1 %v288_v20 }
  0xde   :  { %v103_v22 = vpop.f32.mrb[0].mxu0 }
  0xdf   :  { %v104_v23 = vadd.f32 %v224_v21, %v103_v22  ;;  %v252_v24 = vpop.f32.mrb[1].mxu0 }
  0xe1   :  { %v107_v25 = vmax.f32 %v104_v23, 0.0 }
  0xe3   :  { %270 = vmatmul.mubr.msk.f32.vlgmr.msra.gmra.mrb[0].mxu1 %vm123_vm2, %v107_v25 }
 0x1b6   :  { %v193_v27 = vpop.f32.mrb[0].mxu1 }
 0x1b7   :  { %v194_v28 = vadd.f32 %v226_v26, %v193_v27  ;;  %v271_v29 = vpop.f32.mrb[1].mxu1 }
 0x1b9   :  { %v198_v30 = vsel %vm197_vm3, %v194_v28, -inf }
 0x1ba   :  { %199 = vmax.xlane.f32.xlu0 %v198_v30 }
 0x247   :  { %v200_v31 = vpop.xlane.xlu0 %199 }
 0x248   :  { %v201_v32 = vsub.f32 %v194_v28, %v200_v31 }
 0x24a   :  { %v202_v33 = vmul.f32 1.442695, %v201_v32 }
 0x24c   :  { %294 = vpow2.f32 %v202_v33 }
 0x256   :  { %v295_v34 = vpop.eup %294 }
 0x257   :  { %v204_v35 = vsel %vm197_vm3, %v295_v34, 0.0 }
 0x258   :  { %205 = vadd.xlane.f32.xlu0 %v204_v35 }
 0x2e5   :  { %v206_v36 = vpop.xlane.xlu0 %205 }
 0x2e6   :  { %296 = vrcp.f32 %v206_v36 }
 0x2f0   :  { %v297_v37 = vpop.eup %296 }
 0x2f1   :  { %v208_v38 = vmul.f32 %v297_v37, %v295_v34 }
 0x2f3   :  { %209 = vst.msk [vmem:[#allocation2] sm:$0xff] %vm197_vm3, %v208_v38 }
 0x2f4   :  { %309 = shalt.err (!%p306_p4)
}
 0x2f5   :  { %s310_s23 = scalar_lea.hbm %s421_s5, 128 }
 0x2f6   :  { %p311_p5 = scmp.ne.s32.totalorder %s421_s5, %s310_s23  ;;  %p314_p6 = scmp.lt.u32.totalorder %s310_s23, %s421_s5 }
 0x2f8   :  { %p316_p7 = pnand %p314_p6, %p311_p5 }
 0x2fa   :  { %319 = shalt.err (!%p316_p7)
}
 0x2fb   :  { %219 = dma.vmem_to_hbm [thread:$0]  %s217_s3, 128, %s421_s5, [#allocation3]  }
 0x2fc   :  { %320 = dma.done.wait [#allocation3], 128  }
 0x2fd   :  { %321 = vsyncadd [#allocation3], 4294967168 }
 0x2fe   :  { %223 = vsyncpa [#allocation3], 1 }

</bundles_post_ra>
